<compile_context>
chip_gen: v7x
topology: tpu7x:2x2x1
jax: 0.10.0
libtpu: 0.0.40
codegen_flags: <defaults>
</compile_context>

<pallas_src>
import functools
import math

import jax
import jax.numpy as jnp
from jax.experimental import pallas as pl
from jax.experimental.pallas import tpu as pltpu


def _layernorm_kernel(x_ref, gamma_ref, beta_ref, o_ref, *,
                      eps, hidden, masked, low_prec_epilogue):
    # x_ref: (tm, Hp); gamma_ref / beta_ref: (1, Hp); o_ref: (tm, Hp).
    # Hp may be zero-padded beyond `hidden` (only when hidden % 128 != 0).
    xf = x_ref[...].astype(jnp.float32)

    n = jnp.float32(hidden)
    mean = jnp.sum(xf, axis=-1, keepdims=True) / n  # padded lanes are 0 -> exact

    # Two-pass variance: numerically safe vs. `sumsq - n*mean^2` cancellation.
    centered = xf - mean
    if masked:
        lane = jax.lax.broadcasted_iota(jnp.int32, xf.shape, dimension=1)
        centered = jnp.where(lane < hidden, centered, 0.0)
    # torch.std default is unbiased (ddof = 1).  max(., 1) guards hidden == 1
    # (torch would return NaN there; we return zero variance instead).
    denom = jnp.float32(max(hidden - 1, 1))
    var = jnp.sum(centered * centered, axis=-1, keepdims=True) / denom
    std = jnp.sqrt(var)

    # Divide -> EUP reciprocal (exact) + VPU multiply.
    inv = pl.reciprocal(std + jnp.float32(eps), approx=False)

    if low_prec_epilogue:
        # v7x-class + 16-bit input: keep stats in f32, run the per-element
        # normalize on packed low-precision vregs (VALU is the binding slot).
        dt = x_ref.dtype
        y = ((x_ref[...] - mean.astype(dt)) * inv.astype(dt)
             * gamma_ref[...].astype(dt) + beta_ref[...].astype(dt))
    else:
        gamma = gamma_ref[...].astype(jnp.float32)
        beta = beta_ref[...].astype(jnp.float32)
        y = centered * (inv * gamma) + beta
    o_ref[...] = y.astype(o_ref.dtype)


def _round_up(v, m):
    return ((v + m - 1) // m) * m


def layer_norm(x, gamma, beta, eps=1e-6, *, row_tile=None,
               target_block_bytes=4 << 20):
    """x: [..., H]; gamma, beta: [H].  Returns same shape/dtype as x.

    Semantics intentionally match the BERT hand-rolled LayerNorm (unbiased
    std, eps added to the std) -- NOT torch.nn.LayerNorm.
    """
    orig_shape = x.shape
    hidden = orig_shape[-1]
    rows = int(math.prod(orig_shape[:-1]))
    x2 = x.reshape(rows, hidden)

    itemsize = jnp.dtype(x.dtype).itemsize
    hp = _round_up(hidden, 128)        # lane-dense (unmasked) stores
    pad_h = hp - hidden
    row_mult = 8 if itemsize >= 4 else 16

    # Trace-time hardware query; conservative (v7x-safe) fallback.
    try:
        vmem_capacity = int(pltpu.get_tpu_info().vmem_capacity_bytes)
    except Exception:
        vmem_capacity = 64 * 1024 * 1024
    small_vmem = vmem_capacity <= 64 * 1024 * 1024    # v7x-class (64 MiB / TC)
    vmem_budget = (48 if small_vmem else 100) * 1024 * 1024
    buffer_count = 2 if small_vmem else 3             # deeper pipeline w/ big VMEM
    num_cores = 2 if small_vmem else 1                # proxy: v7x has 2 TCs
    low_prec_epilogue = small_vmem and itemsize == 2

    # Row tile: big blocks amortize the ~0.35us per-grid-step overhead.
    if row_tile is None:
        tm = (target_block_bytes // (hp * itemsize)) // row_mult * row_mult
        tm = max(row_mult, min(tm, 8192))
    else:
        tm = max(row_mult, _round_up(row_tile, row_mult))
    tm = min(tm, _round_up(rows, row_mult))
    # Keep >= num_cores grid steps so the "parallel" axis can shard across TCs.
    if num_cores > 1 and rows > num_cores * row_mult:
        tm = min(tm, _round_up(pl.cdiv(rows, num_cores), row_mult))

    # VMEM estimate: in/out `bufs`-buffered + f32 working-set headroom.
    def vmem_estimate(t, bufs):
        io = 2 * bufs * t * hp * itemsize        # x + out tiles
        work = 2 * t * hp * 4                    # f32 temporaries headroom
        params = 2 * bufs * hp * 4               # gamma / beta (tiny)
        return io + work + params + (1 << 20)

    while tm > row_mult and vmem_estimate(tm, buffer_count) > vmem_budget:
        tm = max(row_mult, (tm // 2) // row_mult * row_mult)

    grid = (pl.cdiv(rows, tm),)

    # Lane padding only when hidden is not a multiple of 128 (no-op for BERT
    # H = 768 / 1024).  Rows are NOT padded: the ragged last grid block is
    # handled by Pallas (per-row statistics => OOB rows are harmless and
    # their writes are dropped).
    gamma2 = gamma.reshape(1, hidden)
    beta2 = beta.reshape(1, hidden)
    if pad_h:
        x2 = jnp.pad(x2, ((0, 0), (0, pad_h)))
        gamma2 = jnp.pad(gamma2, ((0, 0), (0, pad_h)))
        beta2 = jnp.pad(beta2, ((0, 0), (0, pad_h)))

    kernel = functools.partial(_layernorm_kernel, eps=eps, hidden=hidden,
                               masked=bool(pad_h),
                               low_prec_epilogue=low_prec_epilogue)

    def run(bufs):
        def tile_spec():
            if bufs > 2:
                return pl.BlockSpec((tm, hp), lambda i: (i, 0),
                                    pipeline_mode=pl.Buffered(bufs))
            return pl.BlockSpec((tm, hp), lambda i: (i, 0))

        return pl.pallas_call(
            kernel,
            out_shape=jax.ShapeDtypeStruct((rows, hp), x.dtype),
            grid_spec=pltpu.PrefetchScalarGridSpec(
                num_scalar_prefetch=0,
                grid=grid,
                in_specs=[
                    tile_spec(),
                    pl.BlockSpec((1, hp), lambda i: (0, 0)),
                    pl.BlockSpec((1, hp), lambda i: (0, 0)),
                ],
                out_specs=tile_spec(),
            ),
            compiler_params=pltpu.CompilerParams(
                dimension_semantics=("parallel",),
                vmem_limit_bytes=int(min(vmem_estimate(tm, bufs), vmem_budget)),
            ),
        )(x2, gamma2, beta2)

    if buffer_count > 2:
        try:
            out = run(buffer_count)
        except Exception:
            out = run(2)   # deeper buffering unavailable -> default depth-2
    else:
        out = run(2)

    if pad_h:
        out = out[:, :hidden]
    return out.reshape(orig_shape)


if __name__ == "__main__":
    # Small shapes consistent with the module: batch=2, seq=8, hidden=32.
    batch, seq, hidden = 2, 8, 32
    key = jax.random.PRNGKey(0)
    kx, kg, kb = jax.random.split(key, 3)
    x = jax.random.normal(kx, (batch, seq, hidden), dtype=jnp.float32)
    # Parameters (module init is ones/zeros; perturb to exercise the affine path).
    a_2 = jnp.ones((hidden,), jnp.float32) \
        + 0.1 * jax.random.normal(kg, (hidden,), jnp.float32)
    b_2 = 0.1 * jax.random.normal(kb, (hidden,), jnp.float32)
    eps = 1e-6

    out = layer_norm(x, a_2, b_2, eps)
    out = jax.block_until_ready(out)

    # Pure-JAX reference (torch semantics: unbiased std, eps added to std).
    mean = jnp.mean(x, axis=-1, keepdims=True)
    std = jnp.sqrt(jnp.sum((x - mean) ** 2, axis=-1, keepdims=True) / (hidden - 1))
    ref = a_2 * (x - mean) / (std + eps) + b_2

    assert out.shape == x.shape and out.dtype == x.dtype
    assert jnp.allclose(out, ref, atol=1e-5, rtol=1e-5), "mismatch vs reference"
    print("KERNEL_OK")
</pallas_src>

<mosaic_0001>
module attributes {stable_mosaic.version = 11 : i64} {
  func.func @_layernorm_kernel(%arg0: i32, %arg1: memref<16x128xf32, #tpu.memory_space<vmem>>, %arg2: memref<1x128xf32, #tpu.memory_space<vmem>>, %arg3: memref<1x128xf32, #tpu.memory_space<vmem>>, %arg4: memref<16x128xf32, #tpu.memory_space<vmem>>) attributes {dimension_semantics = [#tpu.dimension_semantics<parallel>], iteration_bounds = array<i64: 1>, scalar_prefetch = 0 : i64, scratch_operands = 0 : i64, tpu.core_type = #tpu.core_type<tc>, window_params = [{transform_indices = @transform_0, window_bounds = array<i64: 16, 128>}, {pipeline_mode = #tpu.pipeline_mode<synchronous>, transform_indices = @transform_1, window_bounds = array<i64: 1, 128>}, {pipeline_mode = #tpu.pipeline_mode<synchronous>, transform_indices = @transform_2, window_bounds = array<i64: 1, 128>}, {transform_indices = @transform_3, window_bounds = array<i64: 16, 128>}]} {
    %c0 = arith.constant 0 : index
    %c0_0 = arith.constant 0 : index
    %0 = vector.load %arg1[%c0, %c0_0] : memref<16x128xf32, #tpu.memory_space<vmem>>, vector<16x128xf32>
    %cst = arith.constant dense<0.000000e+00> : vector<16xf32>
    %1 = vector.multi_reduction <add>, %0, %cst [1] : vector<16x128xf32> to vector<16xf32>
    %2 = vector.shape_cast %1 : vector<16xf32> to vector<16x1xf32>
    %cst_1 = arith.constant 3.200000e+01 : f32
    %3 = vector.broadcast %cst_1 : f32 to vector<16x1xf32>
    %4 = arith.divf %2, %3 : vector<16x1xf32>
    %5 = vector.broadcast %4 : vector<16x1xf32> to vector<16x128xf32>
    %6 = arith.subf %0, %5 : vector<16x128xf32>
    %7 = tpu.iota {dimensions = array<i32: 1>} : vector<16x128xi32>
    %c32_i32 = arith.constant 32 : i32
    %8 = vector.broadcast %c32_i32 : i32 to vector<16x128xi32>
    %9 = arith.cmpi slt, %7, %8 : vector<16x128xi32>
    %cst_2 = arith.constant 0.000000e+00 : f32
    %10 = vector.broadcast %cst_2 : f32 to vector<16x128xf32>
    %11 = arith.select %9, %6, %10 : vector<16x128xi1>, vector<16x128xf32>
    %12 = arith.mulf %11, %11 : vector<16x128xf32>
    %cst_3 = arith.constant dense<0.000000e+00> : vector<16xf32>
    %13 = vector.multi_reduction <add>, %12, %cst_3 [1] : vector<16x128xf32> to vector<16xf32>
    %14 = vector.shape_cast %13 : vector<16xf32> to vector<16x1xf32>
    %cst_4 = arith.constant 3.100000e+01 : f32
    %15 = vector.broadcast %cst_4 : f32 to vector<16x1xf32>
    %16 = arith.divf %14, %15 : vector<16x1xf32>
    %17 = math.sqrt %16 : vector<16x1xf32>
    %cst_5 = arith.constant 9.99999997E-7 : f32
    %18 = vector.broadcast %cst_5 : f32 to vector<16x1xf32>
    %19 = arith.addf %17, %18 : vector<16x1xf32>
    %20 = tpu.reciprocal %19 : vector<16x1xf32> -> vector<16x1xf32>
    %c0_6 = arith.constant 0 : index
    %c0_7 = arith.constant 0 : index
    %21 = vector.load %arg2[%c0_6, %c0_7] : memref<1x128xf32, #tpu.memory_space<vmem>>, vector<1x128xf32>
    %c0_8 = arith.constant 0 : index
    %c0_9 = arith.constant 0 : index
    %22 = vector.load %arg3[%c0_8, %c0_9] : memref<1x128xf32, #tpu.memory_space<vmem>>, vector<1x128xf32>
    %23 = vector.broadcast %20 : vector<16x1xf32> to vector<16x128xf32>
    %24 = vector.broadcast %21 : vector<1x128xf32> to vector<16x128xf32>
    %25 = arith.mulf %23, %24 : vector<16x128xf32>
    %26 = arith.mulf %11, %25 : vector<16x128xf32>
    %27 = vector.broadcast %22 : vector<1x128xf32> to vector<16x128xf32>
    %28 = arith.addf %26, %27 : vector<16x128xf32>
    %c0_10 = arith.constant 0 : index
    %c0_11 = arith.constant 0 : index
    %29 = vector.load %arg4[%c0_10, %c0_11] : memref<16x128xf32, #tpu.memory_space<vmem>>, vector<16x128xf32>
    tpu.vector_store %arg4[%c0_10, %c0_11], %28 {strides = array<i32>} : memref<16x128xf32, #tpu.memory_space<vmem>>, vector<16x128xf32>,
    return
  }
  func.func @transform_0(%arg0: i32) -> (i32, i32) {
    %c0_i32 = arith.constant 0 : i32
    %c0_i32_0 = arith.constant 0 : i32
    return %arg0, %c0_i32 : i32, i32
  }
  func.func @transform_1(%arg0: i32) -> (i32, i32) {
    %c0_i32 = arith.constant 0 : i32
    %c0_i32_0 = arith.constant 0 : i32
    %c0_i32_1 = arith.constant 0 : i32
    return %c0_i32, %c0_i32_0 : i32, i32
  }
  func.func @transform_2(%arg0: i32) -> (i32, i32) {
    %c0_i32 = arith.constant 0 : i32
    %c0_i32_0 = arith.constant 0 : i32
    %c0_i32_1 = arith.constant 0 : i32
    return %c0_i32, %c0_i32_0 : i32, i32
  }
  func.func @transform_3(%arg0: i32) -> (i32, i32) {
    %c0_i32 = arith.constant 0 : i32
    %c0_i32_0 = arith.constant 0 : i32
    return %arg0, %c0_i32 : i32, i32
  }
}

</mosaic_0001>

<bundles_post_ra>
// kernel: tpu_custom_call.1
= control target key start
LH: loop header
LB: loop body
LE: loop exit
PB: predicated region body
PF: predicated region fallthrough
CT: control target
= control target key end

     0   :  { %8 = vsyncpa [#allocation3], 0  ;;  %s233_s0 = inlined_call_operand.hbm [shape: f32[16,128], index: 0, kind: input, shape index: {}]   ;;  %s234_s1 = inlined_call_operand.vmem [shape: f32[1,128], index: 1, kind: input, shape index: {}]   ;;  %s235_s2 = inlined_call_operand.vmem [shape: f32[1,128], index: 2, kind: input, shape index: {}]   ;;  %s236_s3 = inlined_call_operand.hbm [shape: f32[16,128], index: 3, kind: output, shape index: {}]  }
   0x1   :  { %9 = vsyncpa [#allocation4], 0  ;;  %s173_s12 = smov [#allocation2]   ;;  %s125_s16 = scalar_lea.hbm %s233_s0, 256 }
   0x2   :  { %s15_s13 = sshll.u32 %s173_s12, 4  ;;  %p126_p0 = scmp.ne.s32.totalorder %s233_s0, %s125_s16  ;;  %s16_s13 = int_to_ptr.vmem [resolvable:$true] %s15_s13 }
   0x3   :  { %p129_p1 = scmp.lt.u32.totalorder %s125_s16, %s233_s0 }
   0x5   :  { %p131_p2 = pnand %p129_p1, %p126_p0 }
   0x7   :  { %134 = shalt.err (!%p131_p2)
}
   0x8   :  { %s135_s21 = scalar_lea.vmem %s16_s13, 256  ;;  %p140_p4 = scmp.lt.s32.totalorder %s16_s13, %s16_s13 }
   0x9   :  { %p136_p3 = scmp.ne.s32.totalorder %s16_s13, %s135_s21  ;;  %p141_p5 = scmp.lt.s32.totalorder %s135_s21, %s135_s21 }
   0xb   :  { %p142_p6 = por %p141_p5, %p140_p4 }
   0xd   :  { %p143_p7 = pnand %p142_p6, %p136_p3 }
   0xf   :  { %146 = shalt.err (!%p143_p7)
}
  0x10   :  { %s174_s22 = smov 128   ;;  %s175_s23 = smov 8  }
  0x11   :  { %21 = dma.hbm_to_vmem [thread:$0]  %s233_s0, 256, %s16_s13, [#allocation3], %s174_s22, %s174_s22, %s175_s23  }
  0x12   :  { %169 = dma.done.wait [#allocation3], 256  }
  0x13   :  { %170 = vsyncadd [#allocation3], 4294967040  ;;  %v29_v0 = vld [vmem:[#allocation2] sm:$0xff]  ;;  %v30_v1 = vld [vmem:[#allocation2 + $0x8] sm:$0xff]  ;;  %v40_v2 = vlaneseq  ;;  %s176_s29 = smov [#allocation5]  }
  0x14   :  { %31 = vadd.xlane.f32.xlu0 %v29_v0  ;;  %v111_v30 = vld [vmem:[%s234_s1] ss:$0 sm:$0xff]  ;;  %s99_s30 = sshll.u32 %s176_s29, 4  ;;  %s100_s30 = int_to_ptr.vmem [resolvable:$true] %s99_s30 }
  0x15   :  { %v41_v3 = vand.u32 127, %v40_v2  ;;  %v112_v33 = vld [vmem:[%s235_s2] ss:$0 sm:$0xff]  ;;  %s147_s4 = scalar_lea.vmem %s100_s30, 256  ;;  %p152_p9 = scmp.lt.s32.totalorder %s100_s30, %s100_s30 }
  0x16   :  { %p148_p8 = scmp.ne.s32.totalorder %s100_s30, %s147_s4  ;;  %p153_p10 = scmp.lt.s32.totalorder %s147_s4, %s147_s4 }
  0x17   :  { %vm42_vm0 = vcmp.lt.s32.totalorder %v41_v3, 32 }
  0x18   :  { %33 = vadd.xlane.f32.xlu0 %v30_v1  ;;  %p154_p11 = por %p153_p10, %p152_p9 }
  0x1a   :  { %p155_p12 = pnand %p154_p11, %p148_p8 }
  0xa1   :  { %v32_v4 = vpop.xlane.xlu0 %31 }
  0xa2   :  { %v36_v5 = vmul.f32 0.03125, %v32_v4 }
  0xa4   :  { %v38_v6 = vsub.f32 %v29_v0, %v36_v5 }
  0xa5   :  { %v34_v7 = vpop.xlane.xlu0 %33 }
  0xa6   :  { %v37_v8 = vmul.f32 0.03125, %v34_v7  ;;  %v43_v9 = vsel %vm42_vm0, %v38_v6, 0.0 }
  0xa7   :  { %v45_v10 = vmul.f32 %v43_v9, %v43_v9 }
  0xa8   :  { %v39_v11 = vsub.f32 %v30_v1, %v37_v8 }
  0xa9   :  { %47 = vadd.xlane.f32.xlu1 %v45_v10 }
  0xaa   :  { %v44_v12 = vsel %vm42_vm0, %v39_v11, 0.0 }
  0xab   :  { %v46_v13 = vmul.f32 %v44_v12, %v44_v12 }
  0xad   :  { %49 = vadd.xlane.f32.xlu1 %v46_v13 }
 0x136   :  { %v48_v14 = vpop.xlane.xlu1 %47 }
 0x137   :  { %v52_v15 = vmul.f32 0.032258064, %v48_v14 }
 0x139   :  { %117 = vrsqrt.f32 %v52_v15  ;;  %vm56_vm1 = vcmp.eq.f32.partialorder %v52_v15, inf  ;;  %v59_v20 = vand.u32 2147483648, %v52_v15  ;;  %vm58_vm2 = vcmp.eq.f32.partialorder %v52_v15, 0.0 }
 0x13a   :  { %v50_v16 = vpop.xlane.xlu1 %49 }
 0x13b   :  { %v53_v17 = vmul.f32 0.032258064, %v50_v16 }
 0x13d   :  { %119 = vrsqrt.f32 %v53_v17  ;;  %vm63_vm3 = vcmp.eq.f32.partialorder %v53_v17, inf  ;;  %v66_v26 = vand.u32 2147483648, %v53_v17  ;;  %vm65_vm4 = vcmp.eq.f32.partialorder %v53_v17, 0.0 }
 0x143   :  { %v118_v18 = vpop.eup %117 }
 0x144   :  { %v55_v19 = vmul.f32 %v118_v18, %v52_v15 }
 0x146   :  { %v57_v21 = vsel %vm56_vm1, %v52_v15, %v55_v19 }
 0x147   :  { %v120_v22 = vpop.eup %119  ;;  %v60_v23 = vsel %vm58_vm2, %v59_v20, %v57_v21 }
 0x148   :  { %v62_v24 = vmul.f32 %v120_v22, %v53_v17  ;;  %v68_v25 = vadd.f32 1e-06, %v60_v23 }
 0x14a   :  { %v64_v27 = vsel %vm63_vm3, %v53_v17, %v62_v24  ;;  %121 = vrcp.f32 %v68_v25 }
 0x14b   :  { %v67_v28 = vsel %vm65_vm4, %v66_v26, %v64_v27 }
 0x14c   :  { %v69_v29 = vadd.f32 1e-06, %v67_v28 }
 0x14e   :  { %123 = vrcp.f32 %v69_v29 }
 0x154   :  { %v122_v31 = vpop.eup %121 }
 0x155   :  { %v80_v32 = vmul.f32 %v122_v31, %v111_v30 }
 0x157   :  { %v82_v34 = vmul.f32 %v80_v32, %v43_v9 }
 0x158   :  { %v124_v35 = vpop.eup %123 }
 0x159   :  { %v81_v36 = vmul.f32 %v124_v35, %v111_v30  ;;  %v90_v37 = vadd.f32 %v112_v33, %v82_v34 }
 0x15b   :  { %v83_v38 = vmul.f32 %v81_v36, %v44_v12  ;;  %92 = vst [vmem:[#allocation5] sm:$0xff] %v90_v37 }
 0x15d   :  { %v91_v39 = vadd.f32 %v112_v33, %v83_v38 }
 0x15f   :  { %93 = vst [vmem:[#allocation5 + $0x8] sm:$0xff] %v91_v39 }
 0x160   :  { %158 = shalt.err (!%p155_p12)
}
 0x161   :  { %s159_s5 = scalar_lea.hbm %s236_s3, 256 }
 0x162   :  { %p160_p13 = scmp.ne.s32.totalorder %s236_s3, %s159_s5  ;;  %p163_p0 = scmp.lt.u32.totalorder %s159_s5, %s236_s3 }
 0x164   :  { %p165_p1 = pnand %p163_p0, %p160_p13 }
 0x166   :  { %168 = shalt.err (!%p165_p1)
}
 0x167   :  { %105 = dma.vmem_to_hbm [thread:$0]  %s100_s30, 256, %s236_s3, [#allocation4], %s174_s22, %s174_s22, %s175_s23  }
 0x168   :  { %171 = dma.done.wait [#allocation4], 256  }
 0x169   :  { %172 = vsyncadd [#allocation4], 4294967040 }
 0x16a   :  { %109 = vsyncpa [#allocation3], 1 }
 0x16b   :  { %110 = vsyncpa [#allocation4], 1 }

</bundles_post_ra>
